<compile_context>
chip_gen: v6e
topology: v6e:2x2x1
jax: 0.10.0
libtpu: 0.0.40
codegen_flags: <defaults>
</compile_context>

<pallas_src>
import functools
import itertools

import jax
import jax.numpy as jnp
import numpy as np
from jax.experimental import pallas as pl
from jax.experimental.pallas import tpu as pltpu


def _cdiv(a, b):
    return -(-a // b)


def _round_up(x, m):
    return _cdiv(x, m) * m


def _newton_recip(d):
    # EUP approx seed (separate VLIW slot, essentially free) + one Newton step:
    # rel err ~1e-7 vs. the 1e-4 / 1e-5 reference tolerance. Bare approx=True would
    # be ~2^-12 rel err and could violate rtol=1e-4, so the refinement is required.
    r0 = pl.reciprocal(d, approx=True)
    return r0 * (2.0 - d * r0)


def _cost_kernel(logits_ref, boxes_ref, neg_w_onehot_ref, tgt_ref, out_ref,
                 *, w_bbox, w_giou):
    # logits_ref:      [TILE_N, C]    flattened pred logits (one N-tile)
    # boxes_ref:       [TILE_N, 4]    flattened pred boxes (cx, cy, w, h)
    # neg_w_onehot_ref:[C, T_pad]     one-hot of target ids, pre-scaled by -cost_class
    # tgt_ref:         [9, T_pad]     rows: cx, cy, w, h, x0, y0, x1, y1, area
    # out_ref:         [TILE_N, T_pad] cost-matrix tile
    logits = logits_ref[...]
    m = jnp.max(logits, axis=-1, keepdims=True)
    e = jnp.exp(logits - m)                                              # [TN, C]
    inv_s = pl.reciprocal(jnp.sum(e, axis=-1, keepdims=True), approx=False)
    p = e * inv_s                                                        # softmax probs [TN, C]

    # class cost: -w_class * softmax(logits)[:, tgt_ids] via a single MXU matmul
    # (weight and sign are folded into the one-hot operand in the wrapper).
    acc = jnp.dot(p, neg_w_onehot_ref[...],
                  preferred_element_type=jnp.float32)                   # [TN, Tp]

    ob = boxes_ref[...]                                                  # [TN, 4]
    o_cx = ob[:, 0:1]
    o_cy = ob[:, 1:2]
    o_w = ob[:, 2:3]
    o_h = ob[:, 3:4]

    t = tgt_ref[...]                                                     # [9, Tp]
    t_cx = t[0:1, :]
    t_cy = t[1:2, :]
    t_w = t[2:3, :]
    t_h = t[3:4, :]
    t_x0 = t[4:5, :]
    t_y0 = t[5:6, :]
    t_x1 = t[6:7, :]
    t_y1 = t[7:8, :]
    area2 = t[8:9, :]

    # cost_bbox = cdist(out_bbox, tgt_bbox, p=1), accumulated directly
    acc = acc + w_bbox * (jnp.abs(o_cx - t_cx) + jnp.abs(o_cy - t_cy) +
                          jnp.abs(o_w - t_w) + jnp.abs(o_h - t_h))

    # pred boxes -> xyxy, computed once per tile as [TN, 1] columns
    o_x0 = o_cx - 0.5 * o_w
    o_y0 = o_cy - 0.5 * o_h
    o_x1 = o_cx + 0.5 * o_w
    o_y1 = o_cy + 0.5 * o_h
    area1 = (o_x1 - o_x0) * (o_y1 - o_y0)                                # [TN, 1]

    inter = (jnp.maximum(jnp.minimum(o_x1, t_x1) - jnp.maximum(o_x0, t_x0), 0.0) *
             jnp.maximum(jnp.minimum(o_y1, t_y1) - jnp.maximum(o_y0, t_y0), 0.0))
    union = area1 + area2 - inter
    iou = inter * _newton_recip(union)

    enclose = (jnp.maximum(jnp.maximum(o_x1, t_x1) - jnp.minimum(o_x0, t_x0), 0.0) *
               jnp.maximum(jnp.maximum(o_y1, t_y1) - jnp.minimum(o_y0, t_y0), 0.0))
    giou = iou - (enclose - union) * _newton_recip(enclose)

    # cost_giou = -giou; single store of the accumulated cost (lane-dense, unmasked vst)
    out_ref[...] = acc - w_giou * giou


def compute_cost_matrix(pred_logits, pred_boxes, tgt_ids, tgt_bbox,
                        cost_class=1.0, cost_bbox=1.0, cost_giou=1.0):
    B, Q, C = pred_logits.shape
    N = B * Q
    T = int(tgt_ids.shape[0])
    if T == 0:
        return jnp.zeros((B, Q, 0), jnp.float32)

    # Lane-dense target axis: pad T up to a multiple of 128 (sliced off on return).
    T_pad = _round_up(T, 128)

    # Balanced N-tiling: target ~1024-row tiles, equalized across the grid so no step
    # carries up to 2x padded work. For large N keep >= 2 grid steps so the "parallel"
    # axis can shard across both v7x TensorCores (irrelevant but harmless on v5e/v6e).
    MAX_TILE_N = 1024
    num_tiles = _cdiv(N, MAX_TILE_N)
    if num_tiles == 1 and N >= 512:
        num_tiles = 2
    TILE_N = _round_up(_cdiv(N, num_tiles), 8)
    N_pad = num_tiles * TILE_N
    # VMEM footprint per step: 2*(TILE_N*T_pad + TILE_N*C + TILE_N*4 + C*T_pad + 9*T_pad)*4B
    # ~= 1.5 MiB at TILE_N=1024, T_pad=128 — far under the scoped default on every generation.

    logits_flat = pred_logits.reshape(N, C).astype(jnp.float32)
    boxes_flat = pred_boxes.reshape(N, 4).astype(jnp.float32)
    if N_pad > N:
        logits_flat = jnp.pad(logits_flat, ((0, N_pad - N), (0, 0)))
        pad_boxes = jnp.tile(jnp.asarray([[0.5, 0.5, 1.0, 1.0]], jnp.float32),
                             (N_pad - N, 1))                             # valid dummy boxes
        boxes_flat = jnp.concatenate([boxes_flat, pad_boxes], axis=0)

    # One-hot [C, T_pad], pre-scaled by -cost_class so the kernel's matmul result is the
    # finished class-cost term (pad columns use id = -1 -> all-zero columns).
    ids = tgt_ids.astype(jnp.int32)
    ids_pad = jnp.pad(ids, (0, T_pad - T), constant_values=-1)
    neg_w_onehot = jnp.where(
        jax.lax.broadcasted_iota(jnp.int32, (C, T_pad), 0) == ids_pad[None, :],
        jnp.float32(-cost_class), jnp.float32(0.0))

    # Target features [9, T_pad]: cx, cy, w, h, x0, y0, x1, y1, area — grid-invariant.
    tb = tgt_bbox.astype(jnp.float32)                                    # [T, 4]
    t_cx, t_cy, t_w, t_h = tb[:, 0], tb[:, 1], tb[:, 2], tb[:, 3]
    t_x0 = t_cx - 0.5 * t_w
    t_y0 = t_cy - 0.5 * t_h
    t_x1 = t_cx + 0.5 * t_w
    t_y1 = t_cy + 0.5 * t_h
    area2 = (t_x1 - t_x0) * (t_y1 - t_y0)
    tgt_feat = jnp.stack([t_cx, t_cy, t_w, t_h, t_x0, t_y0, t_x1, t_y1, area2], axis=0)
    # Pad columns with unit boxes so union/enclose stay nonzero (results are sliced away).
    pad_col = jnp.asarray([0.5, 0.5, 1.0, 1.0, 0.0, 0.0, 1.0, 1.0, 1.0],
                          jnp.float32)[:, None]
    tgt_feat = jnp.concatenate([tgt_feat, jnp.tile(pad_col, (1, T_pad - T))], axis=1)

    kernel = functools.partial(_cost_kernel, w_bbox=float(cost_bbox),
                               w_giou=float(cost_giou))

    cost_est = pl.CostEstimate(
        flops=int(2 * N_pad * C * T_pad + 40 * N_pad * T_pad),
        transcendentals=int(N_pad * C + 2 * N_pad * T_pad),
        bytes_accessed=int(4 * (N_pad * C + N_pad * 4 + C * T_pad
                                + 9 * T_pad + N_pad * T_pad)))

    cost = pl.pallas_call(
        kernel,
        out_shape=jax.ShapeDtypeStruct((N_pad, T_pad), jnp.float32),
        grid=(num_tiles,),
        in_specs=[
            pl.BlockSpec((TILE_N, C), lambda i: (i, 0)),     # logits tile
            pl.BlockSpec((TILE_N, 4), lambda i: (i, 0)),     # boxes tile
            pl.BlockSpec((C, T_pad), lambda i: (0, 0)),      # -w_class * one-hot (untiled)
            pl.BlockSpec((9, T_pad), lambda i: (0, 0)),      # target feats (untiled)
        ],
        out_specs=pl.BlockSpec((TILE_N, T_pad), lambda i: (i, 0)),
        compiler_params=pltpu.CompilerParams(
            dimension_semantics=("parallel",)),
        cost_estimate=cost_est,
    )(logits_flat, boxes_flat, neg_w_onehot, tgt_feat)

    return cost[:N, :T].reshape(B, Q, T)


def _linear_sum_assignment_small(cost):
    """Exact min-cost assignment for a tiny rectangular cost matrix (rows >= cols)."""
    cost = np.asarray(cost, dtype=np.float64)
    n, m = cost.shape
    if m == 0:
        return (np.zeros((0,), dtype=np.int64), np.zeros((0,), dtype=np.int64))
    assert m <= n, "expected num_queries >= num_targets (DETR convention)"
    best_rows, best_cost = None, np.inf
    for rows in itertools.permutations(range(n), m):
        c = sum(cost[rows[j], j] for j in range(m))
        if c < best_cost:
            best_cost, best_rows = c, rows
    pairs = sorted(zip(best_rows, range(m)))
    ri = np.array([p[0] for p in pairs], dtype=np.int64)
    ci = np.array([p[1] for p in pairs], dtype=np.int64)
    return ri, ci


def hungarian_matcher(outputs, targets, cost_class=1.0, cost_bbox=1.0, cost_giou=1.0):
    """JAX/Pallas equivalent of HungarianMatcher.forward."""
    pred_logits = outputs["pred_logits"]
    pred_boxes = outputs["pred_boxes"]
    tgt_ids = jnp.concatenate([t["labels"] for t in targets], axis=0)
    tgt_bbox = jnp.concatenate([t["boxes"] for t in targets], axis=0)
    sizes = [int(t["boxes"].shape[0]) for t in targets]

    C = compute_cost_matrix(pred_logits, pred_boxes, tgt_ids, tgt_bbox,
                            cost_class, cost_bbox, cost_giou)
    C_host = np.asarray(jax.device_get(C))                               # [B, Q, T_total]

    # TODO(synk): the Hungarian algorithm (scipy linear_sum_assignment) has no Pallas
    # equivalent; solved exactly on host (brute force — fine for the tiny demo sizes only).
    indices = []
    offset = 0
    for i, sz in enumerate(sizes):
        block = C_host[i, :, offset:offset + sz]
        ri, ci = _linear_sum_assignment_small(block)
        indices.append((jnp.asarray(ri, dtype=jnp.int32),
                        jnp.asarray(ci, dtype=jnp.int32)))
        offset += sz
    return C, indices


def _reference_cost_matrix(pred_logits, pred_boxes, tgt_ids, tgt_bbox,
                           cost_class=1.0, cost_bbox=1.0, cost_giou=1.0):
    """Pure-numpy reference mirroring the PyTorch math (for a correctness check)."""
    logits = np.asarray(pred_logits, dtype=np.float64)
    B, Q, C = logits.shape
    logits = logits.reshape(B * Q, C)
    probs = np.exp(logits - logits.max(-1, keepdims=True))
    probs /= probs.sum(-1, keepdims=True)
    ids = np.asarray(tgt_ids)
    cc = -probs[:, ids]

    ob = np.asarray(pred_boxes, dtype=np.float64).reshape(B * Q, 4)
    tb = np.asarray(tgt_bbox, dtype=np.float64)
    cb = np.abs(ob[:, None, :] - tb[None, :, :]).sum(-1)

    def to_xyxy(b):
        return np.stack([b[:, 0] - 0.5 * b[:, 2], b[:, 1] - 0.5 * b[:, 3],
                         b[:, 0] + 0.5 * b[:, 2], b[:, 1] + 0.5 * b[:, 3]], axis=-1)

    b1, b2 = to_xyxy(ob), to_xyxy(tb)
    a1 = (b1[:, 2] - b1[:, 0]) * (b1[:, 3] - b1[:, 1])
    a2 = (b2[:, 2] - b2[:, 0]) * (b2[:, 3] - b2[:, 1])
    lt = np.maximum(b1[:, None, :2], b2[None, :, :2])
    rb = np.minimum(b1[:, None, 2:], b2[None, :, 2:])
    wh = np.clip(rb - lt, 0, None)
    inter = wh[:, :, 0] * wh[:, :, 1]
    union = a1[:, None] + a2[None, :] - inter
    iou = inter / union
    lt2 = np.minimum(b1[:, None, :2], b2[None, :, :2])
    rb2 = np.maximum(b1[:, None, 2:], b2[None, :, 2:])
    wh2 = np.clip(rb2 - lt2, 0, None)
    enc = wh2[:, :, 0] * wh2[:, :, 1]
    giou = iou - (enc - union) / enc
    cg = -giou
    return (cost_bbox * cb + cost_class * cc + cost_giou * cg).reshape(B, Q, -1)


if __name__ == "__main__":
    key = jax.random.PRNGKey(0)
    B, Q, NUM_CLASSES = 2, 8, 32
    sizes = [3, 2]  # targets per image

    k1, k2, k3, k4, k5 = jax.random.split(key, 5)
    pred_logits = jax.random.normal(k1, (B, Q, NUM_CLASSES), dtype=jnp.float32)
    # valid cxcywh boxes: centers in (0.3, 0.7), sizes in (0.1, 0.4)
    pred_centers = 0.3 + 0.4 * jax.random.uniform(k2, (B, Q, 2), dtype=jnp.float32)
    pred_wh = 0.1 + 0.3 * jax.random.uniform(k3, (B, Q, 2), dtype=jnp.float32)
    pred_boxes = jnp.concatenate([pred_centers, pred_wh], axis=-1)

    targets = []
    tk = k4
    for sz in sizes:
        tk, ka, kb, kc = jax.random.split(tk, 4)
        labels = jax.random.randint(ka, (sz,), 0, NUM_CLASSES, dtype=jnp.int32)
        centers = 0.3 + 0.4 * jax.random.uniform(kb, (sz, 2), dtype=jnp.float32)
        wh = 0.1 + 0.3 * jax.random.uniform(kc, (sz, 2), dtype=jnp.float32)
        targets.append({"labels": labels, "boxes": jnp.concatenate([centers, wh], axis=-1)})

    outputs = {"pred_logits": pred_logits, "pred_boxes": pred_boxes}

    C, indices = hungarian_matcher(outputs, targets, cost_class=1.0, cost_bbox=1.0, cost_giou=1.0)
    jax.block_until_ready(C)
    for ri, ci in indices:
        jax.block_until_ready(ri)
        jax.block_until_ready(ci)

    # sanity check of the Pallas cost matrix against a numpy reference
    tgt_ids_np = np.concatenate([np.asarray(t["labels"]) for t in targets])
    tgt_bbox_np = np.concatenate([np.asarray(t["boxes"]) for t in targets])
    C_ref = _reference_cost_matrix(pred_logits, pred_boxes, tgt_ids_np, tgt_bbox_np)
    np.testing.assert_allclose(np.asarray(C), C_ref, rtol=1e-4, atol=1e-5)

    print("KERNEL_OK")
</pallas_src>

<mosaic_0001>
module attributes {stable_mosaic.version = 11 : i64} {
  func.func @_cost_kernel(%arg0: i32, %arg1: memref<16x32xf32, #tpu.memory_space<vmem>>, %arg2: memref<16x4xf32, #tpu.memory_space<vmem>>, %arg3: memref<32x128xf32, #tpu.memory_space<vmem>>, %arg4: memref<9x128xf32, #tpu.memory_space<vmem>>, %arg5: memref<16x128xf32, #tpu.memory_space<vmem>>) attributes {dimension_semantics = [#tpu.dimension_semantics<parallel>], iteration_bounds = array<i64: 1>, scalar_prefetch = 0 : i64, scratch_operands = 0 : i64, tpu.core_type = #tpu.core_type<tc>, window_params = [{transform_indices = @transform_0, window_bounds = array<i64: 16, 32>}, {transform_indices = @transform_1, window_bounds = array<i64: 16, 4>}, {pipeline_mode = #tpu.pipeline_mode<synchronous>, transform_indices = @transform_2, window_bounds = array<i64: 32, 128>}, {pipeline_mode = #tpu.pipeline_mode<synchronous>, transform_indices = @transform_3, window_bounds = array<i64: 9, 128>}, {transform_indices = @transform_4, window_bounds = array<i64: 16, 128>}]} {
    %c0 = arith.constant 0 : index
    %c0_0 = arith.constant 0 : index
    %0 = vector.load %arg1[%c0, %c0_0] : memref<16x32xf32, #tpu.memory_space<vmem>>, vector<16x32xf32>
    %cst = arith.constant dense<0xFF800000> : vector<16xf32>
    %1 = vector.multi_reduction <maximumf>, %0, %cst [1] : vector<16x32xf32> to vector<16xf32>
    %2 = vector.shape_cast %1 : vector<16xf32> to vector<16x1xf32>
    %3 = vector.broadcast %2 : vector<16x1xf32> to vector<16x32xf32>
    %4 = arith.subf %0, %3 : vector<16x32xf32>
    %5 = math.exp %4 : vector<16x32xf32>
    %cst_1 = arith.constant dense<0.000000e+00> : vector<16xf32>
    %6 = vector.multi_reduction <add>, %5, %cst_1 [1] : vector<16x32xf32> to vector<16xf32>
    %7 = vector.shape_cast %6 : vector<16xf32> to vector<16x1xf32>
    %8 = tpu.reciprocal %7 : vector<16x1xf32> -> vector<16x1xf32>
    %9 = vector.broadcast %8 : vector<16x1xf32> to vector<16x32xf32>
    %10 = arith.mulf %5, %9 : vector<16x32xf32>
    %c0_2 = arith.constant 0 : index
    %c0_3 = arith.constant 0 : index
    %11 = vector.load %arg3[%c0_2, %c0_3] : memref<32x128xf32, #tpu.memory_space<vmem>>, vector<32x128xf32>
    %cst_4 = arith.constant dense<0.000000e+00> : vector<16x128xf32>
    %12 = tpu.matmul %10, %11, %cst_4 {dimension_numbers = #tpu.dot_dimension_numbers<[1], [0], [0], [1], [0, 0, 1, 1], [], []>} : vector<16x32xf32>, vector<32x128xf32>, vector<16x128xf32> -> vector<16x128xf32>
    %c0_5 = arith.constant 0 : index
    %c0_6 = arith.constant 0 : index
    %13 = vector.load %arg2[%c0_5, %c0_6] : memref<16x4xf32, #tpu.memory_space<vmem>>, vector<16x4xf32>
    %14 = vector.extract_strided_slice %13 {offsets = [0, 0], sizes = [16, 1], strides = [1, 1]} : vector<16x4xf32> to vector<16x1xf32>
    %15 = vector.extract_strided_slice %13 {offsets = [0, 1], sizes = [16, 1], strides = [1, 1]} : vector<16x4xf32> to vector<16x1xf32>
    %16 = vector.extract_strided_slice %13 {offsets = [0, 2], sizes = [16, 1], strides = [1, 1]} : vector<16x4xf32> to vector<16x1xf32>
    %17 = vector.extract_strided_slice %13 {offsets = [0, 3], sizes = [16, 1], strides = [1, 1]} : vector<16x4xf32> to vector<16x1xf32>
    %c0_7 = arith.constant 0 : index
    %c0_8 = arith.constant 0 : index
    %18 = vector.load %arg4[%c0_7, %c0_8] : memref<9x128xf32, #tpu.memory_space<vmem>>, vector<9x128xf32>
    %19 = vector.extract_strided_slice %18 {offsets = [0, 0], sizes = [1, 128], strides = [1, 1]} : vector<9x128xf32> to vector<1x128xf32>
    %20 = vector.extract_strided_slice %18 {offsets = [1, 0], sizes = [1, 128], strides = [1, 1]} : vector<9x128xf32> to vector<1x128xf32>
    %21 = vector.extract_strided_slice %18 {offsets = [2, 0], sizes = [1, 128], strides = [1, 1]} : vector<9x128xf32> to vector<1x128xf32>
    %22 = vector.extract_strided_slice %18 {offsets = [3, 0], sizes = [1, 128], strides = [1, 1]} : vector<9x128xf32> to vector<1x128xf32>
    %23 = vector.extract_strided_slice %18 {offsets = [4, 0], sizes = [1, 128], strides = [1, 1]} : vector<9x128xf32> to vector<1x128xf32>
    %24 = vector.extract_strided_slice %18 {offsets = [5, 0], sizes = [1, 128], strides = [1, 1]} : vector<9x128xf32> to vector<1x128xf32>
    %25 = vector.extract_strided_slice %18 {offsets = [6, 0], sizes = [1, 128], strides = [1, 1]} : vector<9x128xf32> to vector<1x128xf32>
    %26 = vector.extract_strided_slice %18 {offsets = [7, 0], sizes = [1, 128], strides = [1, 1]} : vector<9x128xf32> to vector<1x128xf32>
    %27 = vector.extract_strided_slice %18 {offsets = [8, 0], sizes = [1, 128], strides = [1, 1]} : vector<9x128xf32> to vector<1x128xf32>
    %28 = vector.broadcast %14 : vector<16x1xf32> to vector<16x128xf32>
    %29 = vector.broadcast %19 : vector<1x128xf32> to vector<16x128xf32>
    %30 = arith.subf %28, %29 : vector<16x128xf32>
    %31 = math.absf %30 : vector<16x128xf32>
    %32 = vector.broadcast %15 : vector<16x1xf32> to vector<16x128xf32>
    %33 = vector.broadcast %20 : vector<1x128xf32> to vector<16x128xf32>
    %34 = arith.subf %32, %33 : vector<16x128xf32>
    %35 = math.absf %34 : vector<16x128xf32>
    %36 = arith.addf %31, %35 : vector<16x128xf32>
    %37 = vector.broadcast %16 : vector<16x1xf32> to vector<16x128xf32>
    %38 = vector.broadcast %21 : vector<1x128xf32> to vector<16x128xf32>
    %39 = arith.subf %37, %38 : vector<16x128xf32>
    %40 = math.absf %39 : vector<16x128xf32>
    %41 = arith.addf %36, %40 : vector<16x128xf32>
    %42 = vector.broadcast %17 : vector<16x1xf32> to vector<16x128xf32>
    %43 = vector.broadcast %22 : vector<1x128xf32> to vector<16x128xf32>
    %44 = arith.subf %42, %43 : vector<16x128xf32>
    %45 = math.absf %44 : vector<16x128xf32>
    %46 = arith.addf %41, %45 : vector<16x128xf32>
    %cst_9 = arith.constant 1.000000e+00 : f32
    %47 = vector.broadcast %cst_9 : f32 to vector<16x128xf32>
    %48 = arith.mulf %47, %46 : vector<16x128xf32>
    %49 = arith.addf %12, %48 : vector<16x128xf32>
    %cst_10 = arith.constant 5.000000e-01 : f32
    %50 = vector.broadcast %cst_10 : f32 to vector<16x1xf32>
    %51 = arith.mulf %50, %16 : vector<16x1xf32>
    %52 = arith.subf %14, %51 : vector<16x1xf32>
    %cst_11 = arith.constant 5.000000e-01 : f32
    %53 = vector.broadcast %cst_11 : f32 to vector<16x1xf32>
    %54 = arith.mulf %53, %17 : vector<16x1xf32>
    %55 = arith.subf %15, %54 : vector<16x1xf32>
    %cst_12 = arith.constant 5.000000e-01 : f32
    %56 = vector.broadcast %cst_12 : f32 to vector<16x1xf32>
    %57 = arith.mulf %56, %16 : vector<16x1xf32>
    %58 = arith.addf %14, %57 : vector<16x1xf32>
    %cst_13 = arith.constant 5.000000e-01 : f32
    %59 = vector.broadcast %cst_13 : f32 to vector<16x1xf32>
    %60 = arith.mulf %59, %17 : vector<16x1xf32>
    %61 = arith.addf %15, %60 : vector<16x1xf32>
    %62 = arith.subf %58, %52 : vector<16x1xf32>
    %63 = arith.subf %61, %55 : vector<16x1xf32>
    %64 = arith.mulf %62, %63 : vector<16x1xf32>
    %65 = vector.broadcast %58 : vector<16x1xf32> to vector<16x128xf32>
    %66 = vector.broadcast %25 : vector<1x128xf32> to vector<16x128xf32>
    %67 = arith.minimumf %65, %66 : vector<16x128xf32>
    %68 = vector.broadcast %52 : vector<16x1xf32> to vector<16x128xf32>
    %69 = vector.broadcast %23 : vector<1x128xf32> to vector<16x128xf32>
    %70 = arith.maximumf %68, %69 : vector<16x128xf32>
    %71 = arith.subf %67, %70 : vector<16x128xf32>
    %cst_14 = arith.constant 0.000000e+00 : f32
    %72 = vector.broadcast %cst_14 : f32 to vector<16x128xf32>
    %73 = arith.maximumf %71, %72 : vector<16x128xf32>
    %74 = vector.broadcast %61 : vector<16x1xf32> to vector<16x128xf32>
    %75 = vector.broadcast %26 : vector<1x128xf32> to vector<16x128xf32>
    %76 = arith.minimumf %74, %75 : vector<16x128xf32>
    %77 = vector.broadcast %55 : vector<16x1xf32> to vector<16x128xf32>
    %78 = vector.broadcast %24 : vector<1x128xf32> to vector<16x128xf32>
    %79 = arith.maximumf %77, %78 : vector<16x128xf32>
    %80 = arith.subf %76, %79 : vector<16x128xf32>
    %cst_15 = arith.constant 0.000000e+00 : f32
    %81 = vector.broadcast %cst_15 : f32 to vector<16x128xf32>
    %82 = arith.maximumf %80, %81 : vector<16x128xf32>
    %83 = arith.mulf %73, %82 : vector<16x128xf32>
    %84 = vector.broadcast %64 : vector<16x1xf32> to vector<16x128xf32>
    %85 = vector.broadcast %27 : vector<1x128xf32> to vector<16x128xf32>
    %86 = arith.addf %84, %85 : vector<16x128xf32>
    %87 = arith.subf %86, %83 : vector<16x128xf32>
    %88 = tpu.reciprocal %87 {approx = true} : vector<16x128xf32> -> vector<16x128xf32>
    %89 = arith.mulf %87, %88 : vector<16x128xf32>
    %cst_16 = arith.constant 2.000000e+00 : f32
    %90 = vector.broadcast %cst_16 : f32 to vector<16x128xf32>
    %91 = arith.subf %90, %89 : vector<16x128xf32>
    %92 = arith.mulf %88, %91 : vector<16x128xf32>
    %93 = arith.mulf %83, %92 : vector<16x128xf32>
    %94 = vector.broadcast %58 : vector<16x1xf32> to vector<16x128xf32>
    %95 = vector.broadcast %25 : vector<1x128xf32> to vector<16x128xf32>
    %96 = arith.maximumf %94, %95 : vector<16x128xf32>
    %97 = vector.broadcast %52 : vector<16x1xf32> to vector<16x128xf32>
    %98 = vector.broadcast %23 : vector<1x128xf32> to vector<16x128xf32>
    %99 = arith.minimumf %97, %98 : vector<16x128xf32>
    %100 = arith.subf %96, %99 : vector<16x128xf32>
    %cst_17 = arith.constant 0.000000e+00 : f32
    %101 = vector.broadcast %cst_17 : f32 to vector<16x128xf32>
    %102 = arith.maximumf %100, %101 : vector<16x128xf32>
    %103 = vector.broadcast %61 : vector<16x1xf32> to vector<16x128xf32>
    %104 = vector.broadcast %26 : vector<1x128xf32> to vector<16x128xf32>
    %105 = arith.maximumf %103, %104 : vector<16x128xf32>
    %106 = vector.broadcast %55 : vector<16x1xf32> to vector<16x128xf32>
    %107 = vector.broadcast %24 : vector<1x128xf32> to vector<16x128xf32>
    %108 = arith.minimumf %106, %107 : vector<16x128xf32>
    %109 = arith.subf %105, %108 : vector<16x128xf32>
    %cst_18 = arith.constant 0.000000e+00 : f32
    %110 = vector.broadcast %cst_18 : f32 to vector<16x128xf32>
    %111 = arith.maximumf %109, %110 : vector<16x128xf32>
    %112 = arith.mulf %102, %111 : vector<16x128xf32>
    %113 = arith.subf %112, %87 : vector<16x128xf32>
    %114 = tpu.reciprocal %112 {approx = true} : vector<16x128xf32> -> vector<16x128xf32>
    %115 = arith.mulf %112, %114 : vector<16x128xf32>
    %cst_19 = arith.constant 2.000000e+00 : f32
    %116 = vector.broadcast %cst_19 : f32 to vector<16x128xf32>
    %117 = arith.subf %116, %115 : vector<16x128xf32>
    %118 = arith.mulf %114, %117 : vector<16x128xf32>
    %119 = arith.mulf %113, %118 : vector<16x128xf32>
    %120 = arith.subf %93, %119 : vector<16x128xf32>
    %cst_20 = arith.constant 1.000000e+00 : f32
    %121 = vector.broadcast %cst_20 : f32 to vector<16x128xf32>
    %122 = arith.mulf %121, %120 : vector<16x128xf32>
    %123 = arith.subf %49, %122 : vector<16x128xf32>
    %c0_21 = arith.constant 0 : index
    %c0_22 = arith.constant 0 : index
    %124 = vector.load %arg5[%c0_21, %c0_22] : memref<16x128xf32, #tpu.memory_space<vmem>>, vector<16x128xf32>
    tpu.vector_store %arg5[%c0_21, %c0_22], %123 {strides = array<i32>} : memref<16x128xf32, #tpu.memory_space<vmem>>, vector<16x128xf32>,
    return
  }
  func.func @transform_0(%arg0: i32) -> (i32, i32) {
    %c0_i32 = arith.constant 0 : i32
    %c0_i32_0 = arith.constant 0 : i32
    return %arg0, %c0_i32 : i32, i32
  }
  func.func @transform_1(%arg0: i32) -> (i32, i32) {
    %c0_i32 = arith.constant 0 : i32
    %c0_i32_0 = arith.constant 0 : i32
    return %arg0, %c0_i32 : i32, i32
  }
  func.func @transform_2(%arg0: i32) -> (i32, i32) {
    %c0_i32 = arith.constant 0 : i32
    %c0_i32_0 = arith.constant 0 : i32
    %c0_i32_1 = arith.constant 0 : i32
    return %c0_i32, %c0_i32_0 : i32, i32
  }
  func.func @transform_3(%arg0: i32) -> (i32, i32) {
    %c0_i32 = arith.constant 0 : i32
    %c0_i32_0 = arith.constant 0 : i32
    %c0_i32_1 = arith.constant 0 : i32
    return %c0_i32, %c0_i32_0 : i32, i32
  }
  func.func @transform_4(%arg0: i32) -> (i32, i32) {
    %c0_i32 = arith.constant 0 : i32
    %c0_i32_0 = arith.constant 0 : i32
    return %arg0, %c0_i32 : i32, i32
  }
}

</mosaic_0001>

<bundles_post_ra>
// kernel: tpu_custom_call.1
= control target key start
LH: loop header
LB: loop body
LE: loop exit
PB: predicated region body
PF: predicated region fallthrough
CT: control target
= control target key end

     0   :  { %9 = vsyncpa [#allocation3], 0  ;;  %s673_s0 = inlined_call_operand.vmem [shape: f32[16,32], index: 0, kind: input, shape index: {}]   ;;  %s674_s1 = inlined_call_operand.vmem [shape: f32[16,4], index: 1, kind: input, shape index: {}]   ;;  %s675_s2 = inlined_call_operand.hbm [shape: f32[32,128], index: 2, kind: input, shape index: {}]   ;;  %s676_s3 = inlined_call_operand.hbm [shape: f32[9,128], index: 3, kind: input, shape index: {}]   ;;  %s677_s4 = inlined_call_operand.hbm [shape: f32[16,128], index: 4, kind: output, shape index: {}]  }
   0x1   :  { %10 = vsyncpa [#allocation6], 0 }
   0x2   :  { %11 = vsyncpa [#allocation4], 0  ;;  %s535_s15 = smov [#allocation2]  }
   0x3   :  { %s21_s16 = sshll.u32 %s535_s15, 4  ;;  %s22_s16 = int_to_ptr.vmem [resolvable:$true] %s21_s16 }
   0x4   :  { %s477_s17 = scalar_lea.vmem %s22_s16, 512  ;;  %p482_p1 = scmp.lt.s32.totalorder %s22_s16, %s22_s16 }
   0x5   :  { %p478_p0 = scmp.ne.s32.totalorder %s22_s16, %s477_s17  ;;  %p483_p2 = scmp.lt.s32.totalorder %s477_s17, %s477_s17 }
   0x7   :  { %p484_p3 = por %p483_p2, %p482_p1 }
   0x9   :  { %p485_p4 = pnand %p484_p3, %p478_p0 }
   0xb   :  { %488 = shalt.err (!%p485_p4)
}
   0xc   :  { %s536_s18 = smov 128   ;;  %s537_s19 = smov 8  }
   0xd   :  { %27 = dma.hbm_to_vmem [thread:$0]  %s675_s2, 512, %s22_s16, [#allocation3], %s536_s18, %s536_s18, %s537_s19  }
   0xe   :  { %s538_s22 = smov [#allocation5]  }
   0xf   :  { %s33_s23 = sshll.u32 %s538_s22, 4  ;;  %s34_s23 = int_to_ptr.vmem [resolvable:$true] %s33_s23 }
  0x10   :  { %s497_s24 = scalar_lea.vmem %s34_s23, 256  ;;  %p502_p6 = scmp.lt.s32.totalorder %s34_s23, %s34_s23 }
  0x11   :  { %p498_p5 = scmp.ne.s32.totalorder %s34_s23, %s497_s24  ;;  %p503_p7 = scmp.lt.s32.totalorder %s497_s24, %s497_s24 }
  0x13   :  { %p504_p8 = por %p503_p7, %p502_p6 }
  0x15   :  { %p505_p9 = pnand %p504_p8, %p498_p5 }
  0x17   :  { %508 = shalt.err (!%p505_p9)
}
  0x18   :  { %39 = dma.hbm_to_vmem [thread:$0]  %s676_s3, 256, %s34_s23, [#allocation6], %s536_s18, %s536_s18, %s537_s19  }
  0x19   :  { %529 = dma.done.wait [#allocation3], 512  }
  0x1a   :  { %530 = vsyncadd [#allocation3], 4294966784 }
  0x1b   :  { %531 = dma.done.wait [#allocation6], 256  }
  0x1c   :  { %532 = vsyncadd [#allocation6], 4294967040  ;;  %vm48_vm0 = vcmask 261120   ;;  %v46_v0 = vld [vmem:[%s673_s0] sm:$0xff]  ;;  %v47_v1 = vld [vmem:[%s673_s0 + $0x8] sm:$0xff]  ;;  %s539_s5 = smov 126   ;;  %v89_v46 = vlaneseq }
  0x1d   :  { %v49_v2 = vsel %vm48_vm0, %v46_v0, -inf  ;;  %v52_v3 = vsel %vm48_vm0, %v47_v1, -inf  ;;  %v594_v4 = vld [vmem:[%s674_s1] sm:$0xff]  ;;  %v603_v18 = vld [vmem:[%s674_s1 + $0x8] sm:$0xff]  ;;  %v540_v19 = vmov 0   ;;  %v74_v23 = vld [vmem:[#allocation2 + $0x18] sm:$0xff] }
  0x1e   :  { %50 = vmax.xlane.f32.xlu0 %v49_v2  ;;  %v232_v5 = vmul.f32 0.5, %v594_v4  ;;  %442 = vset.pattern.permute.xlu1 %v540_v19  ;;  %v233_v21 = vmul.f32 0.5, %v603_v18  ;;  %v73_v24 = vld [vmem:[#allocation2 + $0x10] sm:$0xff]  ;;  %s541_s7 = smov 127   ;;  %v72_v25 = vld [vmem:[#allocation2 + $0x8] sm:$0xff]  ;;  %v71_v26 = vld [vmem:[#allocation2] sm:$0xff] }
  0x1f   :  { %441 = vset.pattern.permute.xlu0 %v540_v19  ;;  %419 = vmatprep.subr.mxu0 %v74_v23  ;;  %v542_v34 = vmov 1   ;;  %v543_v40 = vmov 3   ;;  %v544_v43 = vmov 2   ;;  %v619_v47 = vshrl.u32 %v89_v46, 7  ;;  %v622_v51 = vld [vmem:[#allocation5] sm:$0xff]  ;;  %s545_s1 = smov [#allocation7]  }
  0x20   :  { %420 = vmatpush3.msra.mxu0 %v74_v23  ;;  %s397_s8 = sshll.u32 %s545_s1, 4  ;;  %s398_s8 = int_to_ptr.vmem [resolvable:$true] %s397_s8 }
  0x21   :  { %421 = vmatprep.subr.mxu0 %v73_v24  ;;  %v318_v49 = vsub.s32 5, %v619_v47  ;;  %v270_v52 = vsub.s32 6, %v619_v47  ;;  %v286_v53 = vsub.s32 4, %v619_v47  ;;  %v304_v54 = vsub.s32 7, %v619_v47  ;;  %s509_s9 = scalar_lea.vmem %s398_s8, 256  ;;  %p514_p11 = scmp.lt.s32.totalorder %s398_s8, %s398_s8 }
  0x22   :  { %53 = vmax.xlane.f32.xlu0 %v52_v3  ;;  %422 = vmatpush3.msra.mxu0 %v73_v24  ;;  %p510_p10 = scmp.ne.s32.totalorder %s398_s8, %s509_s9  ;;  %p515_p12 = scmp.lt.s32.totalorder %s509_s9, %s509_s9 }
  0x23   :  { %423 = vmatprep.subr.mxu0 %v72_v25  ;;  %v319_v55 = vrot.slane %v622_v51, %v318_v49  ;;  %v271_v58 = vrot.slane %v622_v51, %v270_v52  ;;  %v287_v59 = vrot.slane %v622_v51, %v286_v53  ;;  %v305_v60 = vrot.slane %v622_v51, %v304_v54 }
  0x24   :  { %424 = vmatpush3.msra.mxu0 %v72_v25  ;;  %v125_v54 = vsub.s32 2, %v619_v47  ;;  %p516_p13 = por %p515_p12, %p514_p11 }
  0x25   :  { %425 = vmatprep.subr.mxu0 %v71_v26 }
  0x26   :  { %426 = vmatpush3.msra.mxu0 %v71_v26  ;;  %p517_p0 = pnand %p516_p13, %p510_p10 }
  0x38   :  { %236 = vrot.lane.b32.xlu0 %v232_v5, %s539_s5 }
  0xa7   :  { %v51_v6 = vpop.xlane.xlu0 %50 }
  0xa8   :  { %v55_v7 = vsub.f32 %v46_v0, %v51_v6 }
  0xaa   :  { %v57_v8 = vmul.f32 1.442695, %v55_v7 }
  0xab   :  { %v54_v9 = vpop.xlane.xlu0 %53 }
  0xac   :  { %453 = vpow2.f32 %v57_v8  ;;  %v56_v10 = vsub.f32 %v47_v1, %v54_v9 }
  0xae   :  { %v59_v11 = vmul.f32 1.442695, %v56_v10 }
  0xaf   :  { %v237_v16 = vpop.permute.xlu0 %236 }
  0xb0   :  { %455 = vpow2.f32 %v59_v11  ;;  %v244_v17 = vadd.f32 %v237_v16, %v594_v4  ;;  %v242_v20 = vsub.f32 %v594_v4, %v237_v16  ;;  %v412_v11 = vld [vmem:[#allocation5 + $0x8] ss:$0 sm:$0xff] }
  0xb2   :  { %260 = vperm.xlu0 %441, %v244_v17   ;;  %v246_v22 = vsub.f32 %v244_v17, %v242_v20 }
  0xb9   :  { %v454_v12 = vpop.eup %453 }
  0xba   :  { %v61_v13 = vsel %vm48_vm0, %v454_v12, 0.0 }
  0xbb   :  { %62 = vadd.xlane.f32.xlu1 %v61_v13 }
  0xbd   :  { %v456_v14 = vpop.eup %455 }
  0xbe   :  { %v64_v15 = vsel %vm48_vm0, %v456_v14, 0.0 }
  0xbf   :  { %65 = vadd.xlane.f32.xlu1 %v64_v15 }
  0xd0   :  { %238 = vrot.lane.b32.xlu1 %v233_v21, %s539_s5 }
  0xd4   :  { %250 = vrot.lane.b32.xlu1 %v246_v22, %s541_s7 }
 0x12d   :  { %v261_v50 = vpop.permute.xlu0 %260 }
 0x12e   :  { %v272_v0 = vmin.f32 %v261_v50, %v271_v58  ;;  %v356_v8 = vmax.f32 %v261_v50, %v271_v58 }
 0x144   :  { %v63_v27 = vpop.xlane.xlu1 %62 }
 0x145   :  { %457 = vrcp.f32 %v63_v27 }
 0x148   :  { %v66_v28 = vpop.xlane.xlu1 %65 }
 0x149   :  { %459 = vrcp.f32 %v66_v28 }
 0x14c   :  { %v239_v29 = vpop.permute.xlu1 %238 }
 0x14d   :  { %v243_v30 = vsub.f32 %v603_v18, %v239_v29  ;;  %v245_v31 = vadd.f32 %v239_v29, %v603_v18 }
 0x14f   :  { %281 = vperm.xlu0 %441, %v243_v30   ;;  %v247_v32 = vsub.f32 %v245_v31, %v243_v30 }
 0x150   :  { %v251_v36 = vpop.permute.xlu1 %250 }
 0x151   :  { %252 = vrot.lane.b32.xlu1 %v247_v32, %s541_s7  ;;  %v256_v39 = vmul.f32 %v251_v36, %v246_v22 }
 0x152   :  { %v458_v33 = vpop.eup %457 }
 0x153   :  { %444 = vset.pattern.permute.xlu0 %v542_v34  ;;  %v69_v35 = vmul.f32 %v458_v33, %v454_v12 }
 0x154   :  { %299 = vperm.xlu0 %444, %v245_v31  }
 0x155   :  { %427 = vmatprep.mubr.msk.f32.mxu0 %vm48_vm0, %v69_v35  ;;  %265 = vperm.xlu1 %442, %v245_v31  }
 0x156   :  { %v460_v37 = vpop.eup %459 }
 0x157   :  { %v70_v38 = vmul.f32 %v460_v37, %v456_v14 }
 0x158   :  { %445 = vset.pattern.permute.xlu0 %v540_v19 }
 0x159   :  { %428 = vmatmul.mubr.msk.f32.vlgmr.msra.gmra.mxu0 %vm48_vm0, %v70_v38  ;;  %276 = vperm.xlu1 %442, %v242_v20  }
 0x15a   :  { %330 = vperm.xlu0 %445, %v256_v39  }
 0x15d   :  { %443 = vset.pattern.permute.xlu1 %v542_v34 }
 0x15e   :  { %295 = vperm.xlu1 %443, %v244_v17   ;;  %86 = vperm.xlu0 %445, %v603_v18  }
 0x162   :  { %309 = vperm.xlu1 %443, %v242_v20   ;;  %448 = vset.pattern.permute.xlu0 %v542_v34 }
 0x163   :  { %102 = vperm.xlu0 %448, %v603_v18  }
 0x166   :  { %313 = vperm.xlu1 %443, %v243_v30  }
 0x167   :  { %450 = vset.pattern.permute.xlu0 %v543_v40 }
 0x168   :  { %134 = vperm.xlu0 %450, %v594_v4  }
 0x16a   :  { %446 = vset.pattern.permute.xlu1 %v540_v19 }
 0x16c   :  { %452 = vset.pattern.permute.xlu0 %v540_v19 }
 0x1c3   :  { %v253_v41 = vpop.permute.xlu1 %252 }
 0x1c4   :  { %v257_v42 = vmul.f32 %v253_v41, %v247_v32 }
 0x1c6   :  { %335 = vperm.xlu1 %446, %v257_v42   ;;  %v91_v42 = vsub.s32 0, %v619_v47 }
 0x1c8   :  { %v92_v53 = vrot.slane %v622_v51, %v91_v42 }
 0x1ca   :  { %81 = vperm.xlu1 %446, %v594_v4   ;;  %v282_v57 = vpop.permute.xlu0 %281 }
 0x1cb   :  { %v359_v25 = vmin.f32 %v282_v57, %v287_v59  ;;  %v289_v30 = vmax.f32 %v282_v57, %v287_v59 }
 0x1ce   :  { %447 = vset.pattern.permute.xlu1 %v542_v34 }
 0x1cf   :  { %98 = vperm.xlu1 %447, %v594_v4   ;;  %v300_v2 = vpop.permute.xlu0 %299 }
 0x1d0   :  { %v266_v44 = vpop.permute.xlu1 %265  ;;  %v365_v21 = vmax.f32 %v300_v2, %v305_v60  ;;  %v307_v27 = vmin.f32 %v300_v2, %v305_v60 }
 0x1d1   :  { %v357_v22 = vmax.f32 %v266_v44, %v271_v58  ;;  %v273_v28 = vmin.f32 %v266_v44, %v271_v58 }
 0x1d3   :  { %449 = vset.pattern.permute.xlu1 %v544_v43  ;;  %v361_v29 = vsub.f32 %v357_v22, %v359_v25  ;;  %v291_v33 = vsub.f32 %v273_v28, %v289_v30 }
 0x1d4   :  { %116 = vperm.xlu1 %449, %v594_v4   ;;  %v277_v45 = vpop.permute.xlu1 %276 }
 0x1d5   :  { %v288_v62 = vmax.f32 %v277_v45, %v287_v59  ;;  %v358_v5 = vmin.f32 %v277_v45, %v287_v59  ;;  %v331_v12 = vpop.permute.xlu0 %330  ;;  %v363_v34 = vmax.f32 %v361_v29, 0.0  ;;  %v293_v37 = vmax.f32 %v291_v33, 0.0 }
 0x1d6   :  { %v342_v16 = vadd.f32 %v412_v11, %v331_v12  ;;  %v107_v45 = vsub.s32 1, %v619_v47 }
 0x1d7   :  { %v290_v3 = vsub.f32 %v272_v0, %v288_v62  ;;  %v360_v13 = vsub.f32 %v356_v8, %v358_v5 }
 0x1d8   :  { %120 = vperm.xlu1 %449, %v603_v18  }
 0x1d9   :  { %v296_v48 = vpop.permute.xlu1 %295  ;;  %v292_v9 = vmax.f32 %v290_v3, 0.0  ;;  %v362_v19 = vmax.f32 %v360_v13, 0.0  ;;  %v87_v38 = vpop.permute.xlu0 %86 }
 0x1da   :  { %v306_v63 = vmin.f32 %v296_v48, %v305_v60  ;;  %v364_v6 = vmax.f32 %v296_v48, %v305_v60  ;;  %v143_v48 = vsub.s32 3, %v619_v47 }
 0x1dc   :  { %451 = vset.pattern.permute.xlu1 %v543_v40  ;;  %v144_v58 = vrot.slane %v622_v51, %v143_v48 }
 0x1dd   :  { %138 = vperm.xlu1 %451, %v603_v18   ;;  %v310_v56 = vpop.permute.xlu1 %309 }
 0x1de   :  { %v320_v61 = vmax.f32 %v310_v56, %v319_v55  ;;  %v366_v4 = vmin.f32 %v310_v56, %v319_v55  ;;  %v103_v50 = vpop.permute.xlu0 %102 }
 0x1e0   :  { %v322_v1 = vsub.f32 %v306_v63, %v320_v61  ;;  %v368_v10 = vsub.f32 %v364_v6, %v366_v4  ;;  %v126_v63 = vrot.slane %v622_v51, %v125_v54 }
 0x1e1   :  { %v314_v15 = vpop.permute.xlu1 %313 }
 0x1e2   :  { %v324_v7 = vmax.f32 %v322_v1, 0.0  ;;  %v370_v17 = vmax.f32 %v368_v10, 0.0  ;;  %v367_v18 = vmin.f32 %v314_v15, %v319_v55  ;;  %v321_v24 = vmax.f32 %v314_v15, %v319_v55 }
 0x1e3   :  { %v108_v55 = vrot.slane %v622_v51, %v107_v45  ;;  %v135_v60 = vpop.permute.xlu0 %134 }
 0x1e4   :  { %v631_v14 = vmul.f32 %v324_v7, %v292_v9  ;;  %v636_v23 = vmul.f32 %v370_v17, %v362_v19  ;;  %v369_v26 = vsub.f32 %v365_v21, %v367_v18  ;;  %v323_v31 = vsub.f32 %v307_v27, %v321_v24 }
 0x1e5   :  { %v145_v2 = vsub.f32 %v135_v60, %v144_v58  ;;  %v94_v7 = vsub.f32 %v87_v38, %v92_v53  ;;  %v110_v8 = vsub.f32 %v103_v50, %v108_v55 }
 0x1e6   :  { %v634_v20 = vsub.f32 %v342_v16, %v631_v14  ;;  %v371_v32 = vmax.f32 %v369_v26, 0.0  ;;  %v325_v35 = vmax.f32 %v323_v31, 0.0 }
 0x1e7   :  { %v96_v24 = vand.u32 2147483647, %v94_v7  ;;  %v112_v25 = vand.u32 2147483647, %v110_v8 }
 0x1e8   :  { %461 = vrcp.f32 %v634_v20  ;;  %v640_v36 = vmul.f32 %v371_v32, %v363_v34  ;;  %v642_v40 = vmul.f32 %v325_v35, %v293_v37  ;;  %v374_v15 = vsub.f32 %v636_v23, %v634_v20 }
 0x1e9   :  { %463 = vrcp.f32 %v636_v23 }
 0x1ea   :  { %465 = vrcp.f32 %v640_v36 }
 0x1f5   :  { %v462_v44 = vpop.eup %461 }
 0x1f6   :  { %v464_v49 = vpop.eup %463  ;;  %v348_v52 = vmul.f32 %v462_v44, %v634_v20 }
 0x1f7   :  { %v378_v56 = vmul.f32 %v464_v49, %v636_v23  ;;  %v466_v4 = vpop.eup %465 }
 0x1f8   :  { %v350_v61 = vsub.f32 2.0, %v348_v52  ;;  %v379_v51 = vmul.f32 %v466_v4, %v640_v36 }
 0x1f9   :  { %v380_v0 = vsub.f32 2.0, %v378_v56 }
 0x1fa   :  { %v352_v5 = vmul.f32 %v462_v44, %v350_v61  ;;  %v381_v29 = vsub.f32 2.0, %v379_v51 }
 0x1fb   :  { %v382_v12 = vmul.f32 %v464_v49, %v380_v0 }
 0x1fc   :  { %v354_v18 = vmul.f32 %v352_v5, %v631_v14  ;;  %v114_v14 = vadd.f32 %v112_v25, %v96_v24  ;;  %v383_v38 = vmul.f32 %v466_v4, %v381_v29 }
 0x1fd   :  { %v384_v28 = vmul.f32 %v382_v12, %v374_v15 }
 0x1ff   :  { %v386_v33 = vsub.f32 %v354_v18, %v384_v28 }
 0x219   :  { %v429_v16 = vpop.f32.mrf.mxu0 }
 0x21b   :  { %v223_v30 = vpop.f32.mrf.mxu0 }
 0x241   :  { %v336_v39 = vpop.permute.xlu1 %335 }
 0x242   :  { %v343_v41 = vadd.f32 %v412_v11, %v336_v39  ;;  %v147_v11 = vand.u32 2147483647, %v145_v2 }
 0x244   :  { %v647_v43 = vsub.f32 %v343_v41, %v642_v40 }
 0x245   :  { %v82_v46 = vpop.permute.xlu1 %81 }
 0x246   :  { %467 = vrcp.f32 %v647_v43  ;;  %v93_v62 = vsub.f32 %v82_v46, %v92_v53  ;;  %v375_v34 = vsub.f32 %v640_v36, %v647_v43 }
 0x248   :  { %v95_v47 = vand.u32 2147483647, %v93_v62  ;;  %v385_v44 = vmul.f32 %v383_v38, %v375_v34 }
 0x24a   :  { %v99_v57 = vpop.permute.xlu1 %98 }
 0x24b   :  { %v109_v59 = vsub.f32 %v99_v57, %v108_v55 }
 0x24d   :  { %v111_v1 = vand.u32 2147483647, %v109_v59 }
 0x24f   :  { %v117_v3 = vpop.permute.xlu1 %116  ;;  %v113_v9 = vadd.f32 %v111_v1, %v95_v47 }
 0x250   :  { %v127_v6 = vsub.f32 %v117_v3, %v126_v63 }
 0x252   :  { %v129_v10 = vand.u32 2147483647, %v127_v6 }
 0x253   :  { %v468_v13 = vpop.eup %467  ;;  %v121_v17 = vpop.permute.xlu1 %120 }
 0x254   :  { %v349_v19 = vmul.f32 %v468_v13, %v647_v43  ;;  %v131_v21 = vadd.f32 %v129_v10, %v113_v9  ;;  %v128_v22 = vsub.f32 %v121_v17, %v126_v63 }
 0x256   :  { %v351_v26 = vsub.f32 2.0, %v349_v19  ;;  %v149_v27 = vadd.f32 %v147_v11, %v131_v21  ;;  %v130_v31 = vand.u32 2147483647, %v128_v22 }
 0x258   :  { %v353_v32 = vmul.f32 %v468_v13, %v351_v26  ;;  %v224_v20 = vadd.f32 %v223_v30, %v149_v27  ;;  %v139_v23 = vpop.permute.xlu1 %138  ;;  %v132_v41 = vadd.f32 %v130_v31, %v114_v14 }
 0x259   :  { %v146_v35 = vsub.f32 %v139_v23, %v144_v58 }
 0x25a   :  { %v388_v37 = vsub.f32 %v224_v20, %v386_v33  ;;  %v355_v39 = vmul.f32 %v353_v32, %v642_v40 }
 0x25b   :  { %v148_v42 = vand.u32 2147483647, %v146_v35 }
 0x25c   :  { %390 = vst [vmem:[#allocation7] sm:$0xff] %v388_v37  ;;  %v387_v48 = vsub.f32 %v355_v39, %v385_v44 }
 0x25d   :  { %v150_v45 = vadd.f32 %v148_v42, %v132_v41 }
 0x25f   :  { %v229_v46 = vadd.f32 %v429_v16, %v150_v45 }
 0x261   :  { %v389_v49 = vsub.f32 %v229_v46, %v387_v48 }
 0x263   :  { %391 = vst [vmem:[#allocation7 + $0x8] sm:$0xff] %v389_v49 }
 0x264   :  { %520 = shalt.err (!%p517_p0)
}
 0x265   :  { %403 = dma.vmem_to_hbm [thread:$0]  %s398_s8, 256, %s677_s4, [#allocation4], %s536_s18, %s536_s18, %s537_s19  }
 0x266   :  { %533 = dma.done.wait [#allocation4], 256  }
 0x267   :  { %534 = vsyncadd [#allocation4], 4294967040 }
 0x268   :  { %407 = vsyncpa [#allocation3], 1 }
 0x269   :  { %408 = vsyncpa [#allocation6], 1 }
 0x26a   :  { %409 = vsyncpa [#allocation4], 1 }

</bundles_post_ra>
